<compile_context>
chip_gen: v7x
topology: tpu7x:2x2x1
jax: 0.10.0
libtpu: 0.0.40
codegen_flags: <defaults>
</compile_context>

<pallas_src>
import math

import jax
import jax.numpy as jnp
from jax.experimental import pallas as pl
from jax.experimental.pallas import tpu as pltpu


def _round_up(n, m):
    return ((n + m - 1) // m) * m


def _cdiv(a, b):
    return (a + b - 1) // b


def _largest_divisor_tile(total, cap, align):
    """Largest multiple of `align` that divides `total` and is <= cap.
    `total` must itself be a multiple of `align` (so `align` always works)."""
    cap = max(align, min(cap, total))
    t = (cap // align) * align
    while total % t != 0:
        t -= align
    return t


def _sine_layer_kernel(x_ref, w_ref, b_ref, o_ref):
    """Fused sin(x @ W_omega + b_omega) for one (tm, tn) output tile.

    x_ref: (tm, in_f)   w_ref: (in_f, tn)  (pre-transposed, omega_0 folded in)
    b_ref: (1, tn)      o_ref: (tm, tn)
    Full K lives in one block: no accumulator, W loaded once per output tile.
    x is cast to the weight dtype (bf16) so the MXU runs native bf16 x bf16
    with an f32 accumulation; bias add + sin stay in f32.
    """
    x = x_ref[...].astype(w_ref.dtype)
    z = jnp.dot(x, w_ref[...], preferred_element_type=jnp.float32)
    o_ref[...] = jnp.sin(z + b_ref[...]).astype(o_ref.dtype)


def _sine_layer_kernel_ktiled(x_ref, w_ref, b_ref, o_ref, acc_ref):
    """K-tiled fallback for very large in_features (multiple of 128).

    Grid = (batch, out, K), K last / "arbitrary".  k==0 assigns the first
    partial product directly (no zero-init store), k>0 accumulates, the last
    K step runs the bias + sin epilogue and the only store to o_ref.
    """
    k = pl.program_id(2)
    x = x_ref[...].astype(w_ref.dtype)
    part = jnp.dot(x, w_ref[...], preferred_element_type=jnp.float32)

    @pl.when(k == 0)
    def _():
        acc_ref[...] = part

    @pl.when(k > 0)
    def _():
        acc_ref[...] += part

    @pl.when(k == pl.num_programs(2) - 1)
    def _():
        o_ref[...] = jnp.sin(acc_ref[...] + b_ref[...]).astype(o_ref.dtype)


def init_sine_layer_params(key, in_features, out_features, *, is_first=False,
                           omega_0=30.0, weight_dtype=jnp.bfloat16):
    """Init matching the PyTorch SineLayer (SIREN) scheme.

    Weight: uniform(-1/in, 1/in) if is_first else
            uniform(-sqrt(6/in)/omega_0, +sqrt(6/in)/omega_0).
    Bias:   nn.Linear default, uniform(-1/sqrt(in), 1/sqrt(in)).

    Kernel layout (built ONCE here, never per forward call):
      w_t: (in_features, out_p) = omega_0 * W^T, out axis lane-padded to 128,
                                  stored in `weight_dtype` (bf16 by default).
      b_p: (1, out_p)           = omega_0 * b, f32.
    """
    kw, kb = jax.random.split(key)
    if is_first:
        w_bound = 1.0 / in_features
    else:
        w_bound = math.sqrt(6.0 / in_features) / omega_0
    b_bound = 1.0 / math.sqrt(in_features)

    w = jax.random.uniform(kw, (out_features, in_features), jnp.float32,
                           -w_bound, w_bound)          # PyTorch layout (out, in)
    b = jax.random.uniform(kb, (out_features,), jnp.float32, -b_bound, b_bound)

    out_p = _round_up(out_features, 128)
    w_t = jnp.zeros((in_features, out_p), jnp.float32)
    w_t = w_t.at[:, :out_features].set(omega_0 * w.T).astype(weight_dtype)
    b_p = jnp.zeros((1, out_p), jnp.float32)
    b_p = b_p.at[0, :out_features].set(omega_0 * b)

    return dict(
        w=w, b=b,                     # PyTorch-layout f32 copies (reference)
        w_t=w_t, b_p=b_p,             # kernel layout (transposed, omega-folded)
        in_features=in_features, out_features=out_features,
        omega_0=float(omega_0),
    )


def sine_layer_forward(x, params, *, tm=512, tn_cap=2048,
                       w_tile_budget_bytes=12 * 1024 * 1024):
    """sin(omega_0 * (x @ W^T + b)) via a single fused Pallas kernel.

    x: (..., in_features).  Returns (..., out_features) in x.dtype.
    """
    w_t, b_p = params["w_t"], params["b_p"]
    in_f = params["in_features"]
    out_f = params["out_features"]
    out_p = w_t.shape[1]

    lead_shape = x.shape[:-1]
    assert x.shape[-1] == in_f, (x.shape, in_f)
    x2 = x.reshape(-1, in_f)              # merge leading dims (layout no-op)
    B = x2.shape[0]

    x_bytes = jnp.dtype(x2.dtype).itemsize
    w_bytes = jnp.dtype(w_t.dtype).itemsize
    out_dtype = x2.dtype
    o_bytes = jnp.dtype(out_dtype).itemsize

    # Batch tile: multiple of 8 sublanes; split into >=2 tiles when possible so
    # both v7x TensorCores get work; partial last tile handled by the cdiv grid
    # (its OOB rows only feed OOB output rows, which are dropped).
    tm = min(tm, _round_up(B, 8))
    if B > 8 and _cdiv(B, tm) < 2:
        tm = _round_up(_cdiv(B, 2), 8)
    bm = _cdiv(B, tm)

    # Out tile: lane-dense multiple of 128 dividing out_p, capped so per-step
    # W tiles stay small on v7x's 64 MiB VMEM.
    tn = _largest_divisor_tile(out_p, tn_cap, 128)
    bn = out_p // tn

    # Collapse the K axis (no grid axis, no accumulator) whenever the full
    # (in_f, tn) weight tile fits the budget — true for all typical SIREN widths.
    k_tiled = (in_f * tn * w_bytes > w_tile_budget_bytes) and (in_f % 128 == 0)

    if not k_tiled:
        grid = (bm, bn)
        kernel = _sine_layer_kernel
        in_specs = [
            pl.BlockSpec((tm, in_f), lambda i, j: (i, 0)),   # x tile (full K)
            pl.BlockSpec((in_f, tn), lambda i, j: (0, j)),   # W^T tile (full K)
            pl.BlockSpec((1, tn), lambda i, j: (0, j)),      # bias tile
        ]
        out_specs = pl.BlockSpec((tm, tn), lambda i, j: (i, j))
        scratch_shapes = []
        semantics = ("parallel", "parallel")
        vmem_need = 2 * (tm * in_f * x_bytes + in_f * tn * w_bytes
                         + tn * 4 + tm * tn * o_bytes)
    else:
        tk_cap = max(128, (w_tile_budget_bytes // (tn * w_bytes)) // 128 * 128)
        tk = _largest_divisor_tile(in_f, tk_cap, 128)
        bk = in_f // tk
        grid = (bm, bn, bk)
        kernel = _sine_layer_kernel_ktiled
        in_specs = [
            pl.BlockSpec((tm, tk), lambda i, j, k: (i, k)),
            pl.BlockSpec((tk, tn), lambda i, j, k: (k, j)),
            pl.BlockSpec((1, tn), lambda i, j, k: (0, j)),
        ]
        out_specs = pl.BlockSpec((tm, tn), lambda i, j, k: (i, j))
        scratch_shapes = [pltpu.VMEM((tm, tn), jnp.float32)]
        semantics = ("parallel", "parallel", "arbitrary")
        vmem_need = (2 * (tm * tk * x_bytes + tk * tn * w_bytes
                          + tn * 4 + tm * tn * o_bytes)
                     + tm * tn * 4)

    # Request only what the tiles need (+ headroom); never the whole v7x VMEM.
    vmem_limit = int(min(48 << 20, max(32 << 20, vmem_need + (8 << 20))))

    out = pl.pallas_call(
        kernel,
        out_shape=jax.ShapeDtypeStruct((B, out_p), out_dtype),
        grid=grid,
        in_specs=in_specs,
        out_specs=out_specs,
        scratch_shapes=scratch_shapes,
        compiler_params=pltpu.CompilerParams(
            dimension_semantics=semantics,
            vmem_limit_bytes=vmem_limit,
        ),
    )(x2, w_t, b_p)

    if out_p != out_f:
        out = out[:, :out_f]               # drop lane padding columns only
    return out.reshape(*lead_shape, out_f)


def sine_layer_reference(x, params):
    """Plain-JAX reference matching the PyTorch forward exactly (f32 weights)."""
    z = jnp.dot(x, params["w"].T, precision=jax.lax.Precision.HIGHEST)
    return jnp.sin(params["omega_0"] * (z + params["b"]))


if __name__ == "__main__":
    # Small shapes consistent with the module's forward (a single SineLayer).
    batch = 2
    in_features = 16
    out_features = 32
    omega_0 = 30.0
    is_first = True

    key = jax.random.PRNGKey(0)
    key, kx, kp = jax.random.split(key, 3)
    x = jax.random.normal(kx, (batch, in_features), jnp.float32)
    params = init_sine_layer_params(
        kp, in_features, out_features, is_first=is_first, omega_0=omega_0
    )

    out = jax.block_until_ready(sine_layer_forward(x, params))
    assert out.shape == (batch, out_features), out.shape

    # Tight check against a reference that mirrors the kernel's storage
    # precision (bf16 omega-folded weights, bf16 x into the MXU, f32 accum).
    w_full = params["w_t"].astype(jnp.float32)[:, :out_features]
    b_full = params["b_p"][0, :out_features]
    x_bf = x.astype(jnp.bfloat16).astype(jnp.float32)
    ref_tight = jnp.sin(
        jnp.dot(x_bf, w_full, precision=jax.lax.Precision.HIGHEST) + b_full)
    assert jnp.allclose(out, ref_tight, atol=1e-4, rtol=1e-4), \
        "kernel mismatch vs precision-matched reference"

    # Loose check against the exact f32 PyTorch-equivalent forward; the only
    # gap is the intentional bf16 weight/activation storage rounding.
    ref_exact = sine_layer_reference(x, params)
    assert jnp.allclose(out, ref_exact, atol=1e-1), \
        "kernel drifted from f32 reference beyond expected bf16 storage error"

    print("KERNEL_OK")
</pallas_src>

<mosaic_0001>
module attributes {stable_mosaic.version = 11 : i64} {
  func.func @_sine_layer_kernel(%arg0: i32, %arg1: i32, %arg2: memref<8x16xf32, #tpu.memory_space<vmem>>, %arg3: memref<16x128xbf16, #tpu.memory_space<vmem>>, %arg4: memref<1x128xf32, #tpu.memory_space<vmem>>, %arg5: memref<8x128xf32, #tpu.memory_space<vmem>>) attributes {dimension_semantics = [#tpu.dimension_semantics<parallel>, #tpu.dimension_semantics<parallel>], iteration_bounds = array<i64: 1, 1>, scalar_prefetch = 0 : i64, scratch_operands = 0 : i64, tpu.core_type = #tpu.core_type<tc>, window_params = [{transform_indices = @transform_0, window_bounds = array<i64: 8, 16>}, {transform_indices = @transform_1, window_bounds = array<i64: 16, 128>}, {transform_indices = @transform_2, window_bounds = array<i64: 1, 128>}, {transform_indices = @transform_3, window_bounds = array<i64: 8, 128>}]} {
    %c0 = arith.constant 0 : index
    %c0_0 = arith.constant 0 : index
    %0 = vector.load %arg2[%c0, %c0_0] : memref<8x16xf32, #tpu.memory_space<vmem>>, vector<8x16xf32>
    %1 = arith.truncf %0 : vector<8x16xf32> to vector<8x16xbf16>
    %c0_1 = arith.constant 0 : index
    %c0_2 = arith.constant 0 : index
    %2 = vector.load %arg3[%c0_1, %c0_2] : memref<16x128xbf16, #tpu.memory_space<vmem>>, vector<16x128xbf16>
    %cst = arith.constant dense<0.000000e+00> : vector<8x128xf32>
    %3 = tpu.matmul %1, %2, %cst {dimension_numbers = #tpu.dot_dimension_numbers<[1], [0], [0], [1], [0, 0, 1, 1], [], []>} : vector<8x16xbf16>, vector<16x128xbf16>, vector<8x128xf32> -> vector<8x128xf32>
    %c0_3 = arith.constant 0 : index
    %c0_4 = arith.constant 0 : index
    %4 = vector.load %arg4[%c0_3, %c0_4] : memref<1x128xf32, #tpu.memory_space<vmem>>, vector<1x128xf32>
    %5 = vector.broadcast %4 : vector<1x128xf32> to vector<8x128xf32>
    %6 = arith.addf %3, %5 : vector<8x128xf32>
    %7 = math.sin %6 : vector<8x128xf32>
    %c0_5 = arith.constant 0 : index
    %c0_6 = arith.constant 0 : index
    %8 = vector.load %arg5[%c0_5, %c0_6] : memref<8x128xf32, #tpu.memory_space<vmem>>, vector<8x128xf32>
    tpu.vector_store %arg5[%c0_5, %c0_6], %7 {strides = array<i32>} : memref<8x128xf32, #tpu.memory_space<vmem>>, vector<8x128xf32>,
    return
  }
  func.func @transform_0(%arg0: i32, %arg1: i32) -> (i32, i32) {
    %c0_i32 = arith.constant 0 : i32
    %c0_i32_0 = arith.constant 0 : i32
    return %arg0, %c0_i32 : i32, i32
  }
  func.func @transform_1(%arg0: i32, %arg1: i32) -> (i32, i32) {
    %c0_i32 = arith.constant 0 : i32
    %c0_i32_0 = arith.constant 0 : i32
    return %c0_i32, %arg1 : i32, i32
  }
  func.func @transform_2(%arg0: i32, %arg1: i32) -> (i32, i32) {
    %c0_i32 = arith.constant 0 : i32
    %c0_i32_0 = arith.constant 0 : i32
    return %c0_i32, %arg1 : i32, i32
  }
  func.func @transform_3(%arg0: i32, %arg1: i32) -> (i32, i32) {
    %c0_i32 = arith.constant 0 : i32
    return %arg0, %arg1 : i32, i32
  }
}

</mosaic_0001>

<bundles_post_ra>
// kernel: tpu_custom_call.1
= control target key start
LH: loop header
LB: loop body
LE: loop exit
PB: predicated region body
PF: predicated region fallthrough
CT: control target
= control target key end

     0   :  { %8 = vsyncpa [#allocation3], 0  ;;  %s440_s0 = inlined_call_operand.hbm [shape: f32[2,16], index: 0, kind: input, shape index: {}]   ;;  %s441_s1 = inlined_call_operand.hbm [shape: bf16[16,128], index: 1, kind: input, shape index: {}]   ;;  %s442_s2 = inlined_call_operand.vmem [shape: f32[1,128], index: 2, kind: input, shape index: {}]   ;;  %s443_s3 = inlined_call_operand.hbm [shape: f32[2,128], index: 3, kind: output, shape index: {}]  }
   0x1   :  { %9 = vsyncpa [#allocation6], 0 }
   0x2   :  { %10 = vsyncpa [#allocation4], 0 }
   0x3   :  { %15 = vsyncadd [#allocation3], 96  ;;  %s339_s12 = smov [#allocation2]   ;;  %s267_s16 = scalar_lea.hbm %s440_s0, 32 }
   0x4   :  { %s16_s13 = sshll.u32 %s339_s12, 4  ;;  %p268_p0 = scmp.ne.s32.totalorder %s440_s0, %s267_s16  ;;  %s17_s13 = int_to_ptr.vmem [resolvable:$true] %s16_s13 }
   0x5   :  { %p271_p1 = scmp.lt.u32.totalorder %s267_s16, %s440_s0 }
   0x7   :  { %p273_p2 = pnand %p271_p1, %p268_p0 }
   0x9   :  { %276 = shalt.err (!%p273_p2)
}
   0xa   :  { %s277_s21 = scalar_lea.vmem %s17_s13, 32  ;;  %s281_s22 = scalar_lea.vmem %s17_s13, 128 }
   0xb   :  { %p278_p3 = scmp.ne.s32.totalorder %s17_s13, %s277_s21  ;;  %p282_p4 = scmp.lt.s32.totalorder %s17_s13, %s17_s13 }
   0xc   :  { %p283_p5 = scmp.lt.s32.totalorder %s281_s22, %s277_s21 }
   0xe   :  { %p284_p6 = por %p283_p5, %p282_p4 }
  0x10   :  { %p285_p7 = pnand %p284_p6, %p278_p3 }
  0x12   :  { %288 = shalt.err (!%p285_p7)
}
  0x13   :  { %s340_s23 = smov 32   ;;  %s341_s24 = smov 2  }
  0x14   :  { %22 = dma.hbm_to_vmem [thread:$0]  %s440_s0, 32, %s17_s13, [#allocation3], %s340_s23, %s340_s23, %s341_s24  }
  0x15   :  { %s342_s27 = smov [#allocation5]   ;;  %s289_s4 = scalar_lea.hbm %s441_s1, 128 }
  0x16   :  { %s28_s28 = sshll.u32 %s342_s27, 4  ;;  %p290_p8 = scmp.ne.s32.totalorder %s441_s1, %s289_s4  ;;  %s29_s28 = int_to_ptr.vmem [resolvable:$true] %s28_s28 }
  0x17   :  { %p293_p9 = scmp.lt.u32.totalorder %s289_s4, %s441_s1 }
  0x19   :  { %p295_p10 = pnand %p293_p9, %p290_p8 }
  0x1b   :  { %298 = shalt.err (!%p295_p10)
}
  0x1c   :  { %s299_s9 = scalar_lea.vmem %s29_s28, 128  ;;  %p304_p12 = scmp.lt.s32.totalorder %s29_s28, %s29_s28 }
  0x1d   :  { %p300_p11 = scmp.ne.s32.totalorder %s29_s28, %s299_s9  ;;  %p305_p13 = scmp.lt.s32.totalorder %s299_s9, %s299_s9 }
  0x1f   :  { %p306_p0 = por %p305_p13, %p304_p12 }
  0x21   :  { %p307_p1 = pnand %p306_p0, %p300_p11 }
  0x23   :  { %310 = shalt.err (!%p307_p1)
}
  0x24   :  { %s343_s0 = smov 64   ;;  %s344_s10 = smov 4  }
  0x25   :  { %34 = dma.hbm_to_vmem [thread:$0]  %s441_s1, 128, %s29_s28, [#allocation6], %s343_s0, %s343_s0, %s344_s10  }
  0x26   :  { %333 = dma.done.wait [#allocation3], 128  }
  0x27   :  { %334 = vsyncadd [#allocation3], 4294967168 }
  0x28   :  { %335 = dma.done.wait [#allocation6], 128  }
  0x29   :  { %336 = vsyncadd [#allocation6], 4294967168  ;;  %v345_v0 = vmov 0.0   ;;  %vm346_vm0 = vmmov 0   ;;  %v262_v1 = vld [vmem:[#allocation5] sm:$0xff]   ;;  %v44_v2 = vld [vmem:[#allocation2] sm:$0xff] }
  0x2a   :  { %237 = vmatprep.subr.bf16.mxu0 %v345_v0  ;;  %239 = vmatprep.mubr.msk.bf16.mxu0 %vm346_vm0, %v345_v0  ;;  %v45_v3 = vpack.c.bf16 %v44_v2, %v44_v2  ;;  %vm61_vm1 = vcmask 130048   ;;  %v228_v4 = vld [vmem:[%s442_s2] ss:$0 sm:$0xff]  ;;  %v347_v20 = vmov 683565275  }
  0x2b   :  { %238 = vmatpush3.bf16.msra.mxu0 %v262_v1  ;;  %v348_v22 = vmov 2475754826   ;;  %v349_v25 = vmov 2131351028   ;;  %v350_v28 = vmov 2102212464  }
  0x2c   :  { %v351_v31 = vmov 920167782   ;;  %v352_v34 = vmov 1326507024  }
  0x2e   :  { %240 = vmatmul.mubr.msk.bf16.vlgmr.msra.gmra.mrb[0].mxu0 %vm61_vm1, %v45_v3 }
 0x101   :  { %v99_v5 = vpop.f32.mrb[0].mxu0 }
 0x102   :  { %v404_v6 = vadd.f32 %v228_v4, %v99_v5  ;;  %v241_v7 = vpop.f32.mrb[1].mxu0 }
 0x103   :  { %v102_v8 = vpop.f32.mrb[2].mxu0 }
 0x104   :  { %v108_v9 = vand.u32 2139095040, %v404_v6  ;;  %v242_v10 = vpop.f32.mrb[3].mxu0  ;;  %v105_v14 = vand.u32 2147483647, %v404_v6  ;;  %vm107_vm9 = vcmp.lt.s32.totalorder %v404_v6, 0  ;;  %vm197_vm14 = vweird.f32 %v404_v6 }
 0x106   :  { %v109_v11 = vshrl.u32 %v108_v9, 23  ;;  %v112_v17 = vand.u32 8388607, %v105_v14  ;;  %vm106_vm10 = vcmp.le.f32.partialorder %v105_v14, 0.7853982 }
 0x108   :  { %v231_v12 = vadd.s32 4294967169, %v109_v11  ;;  %v113_v36 = vor.u32 8388608, %v112_v17 }
 0x10a   :  { %v115_v13 = vadd.s32 1, %v231_v12  ;;  %v153_v50 = vshll.u32 %v113_v36, 8 }
 0x10c   :  { %vm116_vm2 = vcmp.gt.s32.totalorder %v115_v13, 0 }
 0x10d   :  { %v117_v15 = vsel %vm116_vm2, %v115_v13, 0 }
 0x10e   :  { %v119_v16 = vand.u32 31, %v117_v15  ;;  %v118_v19 = vshrl.u32 %v117_v15, 5 }
 0x110   :  { %v120_v18 = vsub.s32 32, %v119_v16  ;;  %v122_v21 = vshll.u32 %v347_v20, %v119_v16  ;;  %v125_v23 = vshll.u32 %v348_v22, %v119_v16  ;;  %v128_v27 = vshll.u32 %v349_v25, %v119_v16 }
 0x111   :  { %v131_v30 = vshll.u32 %v350_v28, %v119_v16  ;;  %v134_v33 = vshll.u32 %v351_v31, %v119_v16  ;;  %vm137_vm3 = vcmp.lt.s32.totalorder %v118_v19, 1  ;;  %vm140_vm4 = vcmp.lt.s32.totalorder %v118_v19, 4 }
 0x112   :  { %v123_v24 = vshrl.u32 %v348_v22, %v120_v18  ;;  %v126_v26 = vshrl.u32 %v349_v25, %v120_v18  ;;  %v129_v29 = vshrl.u32 %v350_v28, %v120_v18  ;;  %v132_v32 = vshrl.u32 %v351_v31, %v120_v18 }
 0x113   :  { %v135_v35 = vshrl.u32 %v352_v34, %v120_v18  ;;  %v121_v45 = vshrl.u32 %v347_v20, %v120_v18  ;;  %vm139_vm5 = vcmp.lt.s32.totalorder %v118_v19, 3  ;;  %vm138_vm6 = vcmp.lt.s32.totalorder %v118_v19, 2 }
 0x114   :  { %v124_v37 = vor.u32 %v123_v24, %v122_v21  ;;  %v127_v38 = vor.u32 %v126_v26, %v125_v23  ;;  %v130_v39 = vor.u32 %v129_v29, %v128_v27  ;;  %v133_v40 = vor.u32 %v132_v32, %v131_v30 }
 0x115   :  { %v136_v41 = vor.u32 %v135_v35, %v134_v33 }
 0x116   :  { %v142_v42 = vsel %vm140_vm4, %v130_v39, 2102212464  ;;  %v145_v43 = vsel %vm137_vm3, %v124_v37, %v127_v38  ;;  %v149_v44 = vsel %vm137_vm3, %v127_v38, %v130_v39  ;;  %v146_v46 = vsel %vm140_vm4, %v133_v40, 920167782 }
 0x117   :  { %v150_v47 = vsel %vm140_vm4, %v136_v41, 1326507024  ;;  %v147_v48 = vsel %vm139_vm5, %v130_v39, %v146_v46  ;;  %v141_v51 = vsel %vm137_vm3, %v121_v45, %v124_v37  ;;  %v143_v52 = vsel %vm139_vm5, %v127_v38, %v142_v42 }
 0x118   :  { %v151_v49 = vsel %vm139_vm5, %v133_v40, %v150_v47  ;;  %v148_v53 = vsel %vm138_vm6, %v145_v43, %v147_v48  ;;  %v144_v59 = vsel %vm138_vm6, %v141_v51, %v143_v52 }
 0x119   :  { %v152_v54 = vsel %vm138_vm6, %v149_v44, %v151_v49  ;;  %v413_v57 = vmul.u32.u64.low %v153_v50, %v148_v53  ;;  %v414_v58 = vmul.u32.u64.high %v153_v50, %v148_v53, %v413_v57  ;;  %v160_v61 = vmul.u32 %v153_v50, %v144_v59 }
 0x11a   :  { %v410_v55 = vmul.u32.u64.low %v153_v50, %v152_v54  ;;  %v411_v56 = vmul.u32.u64.high %v153_v50, %v152_v54, %v410_v55 }
 0x11b   :  { %v163_v60 = vadd.s32 1, %v414_v58 }
 0x11c   :  { %vm162_vm7 = vc.u32 %v411_v56, %v413_v57  ;;  %v161_v10 = vadd.s32 %v413_v57, %v411_v56 }
 0x11d   :  { %v164_v62 = vsel %vm162_vm7, %v163_v60, %v414_v58 }
 0x11e   :  { %v165_v63 = vadd.s32 %v164_v62, %v160_v61 }
 0x120   :  { %v166_v0 = vadd.s32 536870912, %v165_v63 }
 0x122   :  { %v167_v1 = vshrl.u32 %v166_v0, 30 }
 0x124   :  { %v168_v2 = vshll.u32 %v167_v1, 30  ;;  %v191_v23 = vsub.s32 4, %v167_v1 }
 0x126   :  { %v169_v3 = vsub.s32 %v165_v63, %v168_v2  ;;  %v192_v26 = vsel %vm107_vm9, %v191_v23, %v167_v1 }
 0x127   :  { %v194_v28 = vsel %vm106_vm10, 0, %v192_v26 }
 0x128   :  { %v171_v4 = vsub.s32 0, %v169_v3  ;;  %v198_v29 = vadd.s32 3, %v194_v28 }
 0x12a   :  { %v232_v5 = vmin.u32 %v171_v4, %v169_v3  ;;  %v199_v30 = vand.u32 3, %v198_v29 }
 0x12c   :  { %v173_v7 = vclz %v232_v5  ;;  %vm204_vm11 = vcmp.eq.s32.totalorder %v199_v30, 2  ;;  %vm201_vm12 = vcmp.eq.s32.totalorder %v199_v30, 0  ;;  %vm200_vm13 = vcmp.lt.s32.totalorder %v199_v30, 2 }
 0x12e   :  { %v233_v8 = vadd.s32 4294967294, %v173_v7 }
 0x130   :  { %vm234_vm8 = vcmp.lt.s32.totalorder %v233_v8, 0 }
 0x131   :  { %v176_v9 = vsel %vm234_vm8, 0, %v233_v8 }
 0x132   :  { %v177_v11 = vsub.s32 32, %v176_v9  ;;  %v181_v12 = vsub.s32 4294967266, %v176_v9  ;;  %v178_v13 = vshll.u32 %v169_v3, %v176_v9 }
 0x134   :  { %v179_v15 = vshrl.u32 %v161_v10, %v177_v11  ;;  %v182_v16 = vadd.s32 127, %v181_v12 }
 0x136   :  { %v180_v17 = vor.u32 %v179_v15, %v178_v13  ;;  %v183_v18 = vshll.u32 %v182_v16, 23 }
 0x138   :  { %v184_v19 = vor.u32 4788187, %v183_v18  ;;  %v187_v21 = vcvt.s32.f32 %v180_v17 }
 0x13a   :  { %v185_v20 = vand.u32 2147483647, %v184_v19 }
 0x13c   :  { %v188_v22 = vmul.f32 %v187_v21, %v185_v20 }
 0x13e   :  { %v189_v24 = vxor.u32 2147483648, %v188_v22 }
 0x140   :  { %v190_v25 = vsel %vm107_vm9, %v189_v24, %v188_v22 }
 0x141   :  { %v193_v27 = vsel %vm106_vm10, %v404_v6, %v190_v25 }
 0x142   :  { %263 = vcosq.f32 %v193_v27 }
 0x143   :  { %265 = vsinq.f32 %v193_v27 }
 0x14c   :  { %v264_v31 = vpop.eup %263 }
 0x14d   :  { %v266_v32 = vpop.eup %265  ;;  %v205_v33 = vxor.u32 2147483648, %v264_v31 }
 0x14e   :  { %v202_v34 = vxor.u32 2147483648, %v266_v32 }
 0x14f   :  { %v206_v35 = vsel %vm204_vm11, %v205_v33, %v266_v32 }
 0x150   :  { %v203_v36 = vsel %vm201_vm12, %v264_v31, %v202_v34 }
 0x151   :  { %v207_v14 = vsel %vm200_vm13, %v203_v36, %v206_v35 }
 0x152   :  { %v208_v37 = vsel %vm197_vm14, nan, %v207_v14 }
 0x153   :  { %209 = vst [vmem:[#allocation7] sm:$0xff] %v208_v37 }
 0x154   :  { %214 = vsyncadd [#allocation4], 96  ;;  %s353_s1 = smov [#allocation7]  }
 0x155   :  { %s215_s2 = sshll.u32 %s353_s1, 4  ;;  %s216_s2 = int_to_ptr.vmem [resolvable:$true] %s215_s2 }
 0x156   :  { %s311_s15 = scalar_lea.vmem %s216_s2, 32  ;;  %s315_s16 = scalar_lea.vmem %s216_s2, 128 }
 0x157   :  { %p312_p2 = scmp.ne.s32.totalorder %s216_s2, %s311_s15  ;;  %p316_p3 = scmp.lt.s32.totalorder %s216_s2, %s216_s2 }
 0x158   :  { %p317_p4 = scmp.lt.s32.totalorder %s315_s16, %s311_s15 }
 0x15a   :  { %p318_p5 = por %p317_p4, %p316_p3 }
 0x15c   :  { %p319_p6 = pnand %p318_p5, %p312_p2 }
 0x15e   :  { %322 = shalt.err (!%p319_p6)
}
 0x15f   :  { %s323_s19 = scalar_lea.hbm %s443_s3, 32 }
 0x160   :  { %p324_p7 = scmp.ne.s32.totalorder %s443_s3, %s323_s19  ;;  %p327_p8 = scmp.lt.u32.totalorder %s323_s19, %s443_s3 }
 0x162   :  { %p329_p9 = pnand %p327_p8, %p324_p7 }
 0x164   :  { %332 = shalt.err (!%p329_p9)
}
 0x165   :  { %221 = dma.vmem_to_hbm [thread:$0]  %s216_s2, 32, %s443_s3, [#allocation4], %s340_s23, %s340_s23, %s341_s24  }
 0x166   :  { %337 = dma.done.wait [#allocation4], 128  }
 0x167   :  { %338 = vsyncadd [#allocation4], 4294967168 }
 0x168   :  { %225 = vsyncpa [#allocation3], 1 }
 0x169   :  { %226 = vsyncpa [#allocation6], 1 }
 0x16a   :  { %227 = vsyncpa [#allocation4], 1 }

</bundles_post_ra>
